<compile_context>
chip_gen: v6e
topology: v6e:2x2x1
jax: 0.10.0
libtpu: 0.0.40
codegen_flags: <defaults>
</compile_context>

<pallas_src>
import functools

import jax
import jax.numpy as jnp
from jax.experimental import pallas as pl
from jax.experimental.pallas import tpu as pltpu


_NEG_LARGE = -1e30  # masks padded class lanes before softmax


def _round_up(x, m):
    return (x + m - 1) // m * m


def _vmem_capacity_bytes():
    """Per-generation VMEM capacity; conservative fallback if the query fails
    (e.g. when running under the CPU interpreter)."""
    try:
        return int(pltpu.get_tpu_info().vmem_capacity_bytes)
    except Exception:
        return 64 * 2**20  # v7x-sized (smallest); v5e/v6e have 128 MiB


def ensemble_kernel(x_ref, w_ref, b_ref, o_ref):
    # x_ref: (TB, Dp) input dtype | w_ref: (Dp, NCP) bf16 | b_ref: (1, NCP) f32
    # o_ref: (TB, NC) f32   (NC = true class count, NCP = 128-padded)
    x = x_ref[...].astype(jnp.bfloat16)                 # in-kernel cast (VPU)
    logits = jnp.dot(x, w_ref[...],
                     preferred_element_type=jnp.float32) + b_ref[...]
    # Numerically stable softmax over classes; padded class lanes carry a
    # -1e30 bias so exp() underflows to exactly 0 and drops out of the sum.
    m = jnp.max(logits, axis=1, keepdims=True)
    e = jnp.exp(logits - m)
    denom = jnp.sum(e, axis=1, keepdims=True)
    probs = e / denom                                   # exact normalization
    o_ref[...] = probs[:, : o_ref.shape[1]]             # drop padded lanes


@functools.partial(jax.jit, static_argnames=("block_b",))
def ensemble_forward(x_nchw, params, block_b=512):
    B = x_nchw.shape[0]
    D = x_nchw.shape[1] * x_nchw.shape[2] * x_nchw.shape[3]
    num_classes = params["wm"].shape[0]

    # ---- algebraic fold of the three heads + multi_fc (once, in f32) --------
    w_sum = params["wa"] + params["wb"] + params["wc"]        # (D, nc)
    b_sum = params["ba"] + params["bb"] + params["bc"]        # (1, nc)
    w_eff = w_sum @ params["wm"]                              # (D, nc)
    b_eff = b_sum @ params["wm"] + params["bm"]               # (1, nc)

    # ---- TPU-friendly padded shapes (classes -> 128 lanes, K -> 128) --------
    # NOTE: 256-aligned K would match the v6e/v7x MXU depth; the kernel is
    # HBM-bound on streaming x so the difference is marginal -- keep 128.
    ncp = _round_up(num_classes, 128)
    dp = _round_up(D, 128)

    w_p = jnp.zeros((dp, ncp), jnp.bfloat16).at[:D, :num_classes].set(
        w_eff.astype(jnp.bfloat16))
    b_p = jnp.full((1, ncp), _NEG_LARGE, jnp.float32).at[:, :num_classes].set(
        b_eff.astype(jnp.float32))

    # ---- x: stream the caller's array directly whenever possible ------------
    x_flat = x_nchw.reshape(B, D)
    if D == dp:
        x_in = x_flat                               # fast path: zero-copy
    else:
        x_in = jnp.zeros((B, dp), x_flat.dtype).at[:, :D].set(x_flat)
    x_itemsize = jnp.dtype(x_in.dtype).itemsize

    # ---- batch tile: big tiles, >=2 grid steps, fits VMEM -------------------
    vmem_cap = _vmem_capacity_bytes()
    if B < 16:
        tb = B                                          # single full-dim block
    else:
        tb = _round_up(min(block_b, pl.cdiv(B, 2)), 8)  # >=2 steps (v7x 2 TCs)

    def footprint(t):
        return (2 * t * dp * x_itemsize        # x tiles, double-buffered
                + 2 * dp * ncp * 2             # W_eff bf16 (default 2 bufs)
                + 2 * ncp * 4                  # bias
                + 2 * t * num_classes * 4      # output tiles
                + 4 * t * ncp * 4)             # f32 softmax temporaries

    while tb > 8 and footprint(tb) > 0.6 * vmem_cap:
        tb = max(8, _round_up(tb // 2, 8))

    grid = (pl.cdiv(B, tb),)   # partial last block: reads padded, writes masked

    vmem_limit = int(min(0.75 * vmem_cap,
                         max(footprint(tb) + (4 << 20), 8 << 20)))

    cost = pl.CostEstimate(
        flops=2 * B * dp * ncp,
        transcendentals=B * ncp,
        bytes_accessed=(B * dp * x_itemsize + dp * ncp * 2
                        + ncp * 4 + B * num_classes * 4),
    )

    out = pl.pallas_call(
        ensemble_kernel,
        out_shape=jax.ShapeDtypeStruct((B, num_classes), jnp.float32),
        grid=grid,
        in_specs=[
            pl.BlockSpec((tb, dp), lambda i: (i, 0)),    # x: streamed per tile
            pl.BlockSpec((dp, ncp), lambda i: (0, 0)),   # W_eff: VMEM-resident
            pl.BlockSpec((1, ncp), lambda i: (0, 0)),    # b_eff: VMEM-resident
        ],
        out_specs=pl.BlockSpec((tb, num_classes), lambda i: (i, 0)),
        compiler_params=pltpu.CompilerParams(
            dimension_semantics=("parallel",),
            vmem_limit_bytes=vmem_limit,
        ),
        cost_estimate=cost,
    )(x_in, w_p, b_p)

    return out


def make_params(key, in_features, num_classes):
    """Deterministic synthetic parameters.  Linear weights are stored
    pre-transposed as (in, out); biases as (1, out)."""
    ks = jax.random.split(key, 8)
    scale_in = 1.0 / jnp.sqrt(in_features)
    scale_nc = 1.0 / jnp.sqrt(num_classes)
    return {
        "wa": jax.random.normal(ks[0], (in_features, num_classes), jnp.float32) * scale_in,
        "ba": jax.random.normal(ks[1], (1, num_classes), jnp.float32) * 0.1,
        "wb": jax.random.normal(ks[2], (in_features, num_classes), jnp.float32) * scale_in,
        "bb": jax.random.normal(ks[3], (1, num_classes), jnp.float32) * 0.1,
        "wc": jax.random.normal(ks[4], (in_features, num_classes), jnp.float32) * scale_in,
        "bc": jax.random.normal(ks[5], (1, num_classes), jnp.float32) * 0.1,
        "wm": jax.random.normal(ks[6], (num_classes, num_classes), jnp.float32) * scale_nc,
        "bm": jax.random.normal(ks[7], (1, num_classes), jnp.float32) * 0.1,
    }


def ensemble_reference(x_nchw, params):
    """Pure-JAX f32 reference of the original module semantics."""
    B = x_nchw.shape[0]
    x = x_nchw.reshape(B, -1).astype(jnp.float32)
    o1 = x @ params["wa"] + params["ba"]
    o2 = x @ params["wb"] + params["bb"]
    o3 = x @ params["wc"] + params["bc"]
    logits = (o1 + o2 + o3) @ params["wm"] + params["bm"]
    return jax.nn.softmax(logits, axis=1)


def ensemble_reference_bf16(x_nchw, params):
    """Reference applying the same algebraic fold + bf16 quantization of
    x / W_eff as the kernel (f32 accumulation), for a tight comparison."""
    B = x_nchw.shape[0]
    x = x_nchw.reshape(B, -1).astype(jnp.float32)
    w_eff = (params["wa"] + params["wb"] + params["wc"]) @ params["wm"]
    b_eff = (params["ba"] + params["bb"] + params["bc"]) @ params["wm"] + params["bm"]
    xq = x.astype(jnp.bfloat16).astype(jnp.float32)
    wq = w_eff.astype(jnp.bfloat16).astype(jnp.float32)
    logits = xq @ wq + b_eff
    return jax.nn.softmax(logits, axis=1)


if __name__ == "__main__":
    key = jax.random.PRNGKey(0)
    k_x, k_p = jax.random.split(key)

    B, C, H, W = 2, 4, 16, 16          # NCHW input
    num_classes = 8
    in_features = C * H * W

    x = jax.random.normal(k_x, (B, C, H, W), jnp.float32)
    params = make_params(k_p, in_features, num_classes)

    out = ensemble_forward(x, params)
    out = jax.block_until_ready(out)
    assert out.shape == (B, num_classes)

    # Tight check vs a reference with the same fold + bf16 quantization.
    ref_q = ensemble_reference_bf16(x, params)
    assert jnp.allclose(out, ref_q, atol=1e-3, rtol=1e-3), \
        float(jnp.max(jnp.abs(out - ref_q)))

    # Looser check vs the full-f32 semantics of the original module
    # (bf16 streaming of x / W_eff introduces ~1e-3-level differences).
    ref = ensemble_reference(x, params)
    assert jnp.allclose(out, ref, atol=2e-2, rtol=2e-2), \
        float(jnp.max(jnp.abs(out - ref)))

    # Probabilities normalize exactly (division-based softmax).
    assert jnp.allclose(jnp.sum(out, axis=1), jnp.ones((B,)), atol=1e-3)

    print("KERNEL_OK")
</pallas_src>

<mosaic_0001>
module attributes {stable_mosaic.version = 11 : i64} {
  func.func @ensemble_kernel(%arg0: i32, %arg1: memref<2x1024xf32, #tpu.memory_space<vmem>>, %arg2: memref<1024x128xbf16, #tpu.memory_space<vmem>>, %arg3: memref<1x128xf32, #tpu.memory_space<vmem>>, %arg4: memref<2x8xf32, #tpu.memory_space<vmem>>) attributes {dimension_semantics = [#tpu.dimension_semantics<parallel>], iteration_bounds = array<i64: 1>, scalar_prefetch = 0 : i64, scratch_operands = 0 : i64, tpu.core_type = #tpu.core_type<tc>, window_params = [{transform_indices = @transform_0, window_bounds = array<i64: 2, 1024>}, {pipeline_mode = #tpu.pipeline_mode<synchronous>, transform_indices = @transform_1, window_bounds = array<i64: 1024, 128>}, {pipeline_mode = #tpu.pipeline_mode<synchronous>, transform_indices = @transform_2, window_bounds = array<i64: 1, 128>}, {transform_indices = @transform_3, window_bounds = array<i64: 2, 8>}]} {
    %c0 = arith.constant 0 : index
    %c0_0 = arith.constant 0 : index
    %0 = vector.load %arg1[%c0, %c0_0] : memref<2x1024xf32, #tpu.memory_space<vmem>>, vector<2x1024xf32>
    %1 = arith.truncf %0 : vector<2x1024xf32> to vector<2x1024xbf16>
    %c0_1 = arith.constant 0 : index
    %c0_2 = arith.constant 0 : index
    %2 = vector.load %arg2[%c0_1, %c0_2] : memref<1024x128xbf16, #tpu.memory_space<vmem>>, vector<1024x128xbf16>
    %cst = arith.constant dense<0.000000e+00> : vector<2x128xf32>
    %3 = tpu.matmul %1, %2, %cst {dimension_numbers = #tpu.dot_dimension_numbers<[1], [0], [0], [1], [0, 0, 1, 1], [], []>} : vector<2x1024xbf16>, vector<1024x128xbf16>, vector<2x128xf32> -> vector<2x128xf32>
    %c0_3 = arith.constant 0 : index
    %c0_4 = arith.constant 0 : index
    %4 = vector.load %arg3[%c0_3, %c0_4] : memref<1x128xf32, #tpu.memory_space<vmem>>, vector<1x128xf32>
    %5 = vector.broadcast %4 : vector<1x128xf32> to vector<2x128xf32>
    %6 = arith.addf %3, %5 : vector<2x128xf32>
    %cst_5 = arith.constant dense<0xFF800000> : vector<2xf32>
    %7 = vector.multi_reduction <maximumf>, %6, %cst_5 [1] : vector<2x128xf32> to vector<2xf32>
    %8 = vector.shape_cast %7 : vector<2xf32> to vector<2x1xf32>
    %9 = vector.broadcast %8 : vector<2x1xf32> to vector<2x128xf32>
    %10 = arith.subf %6, %9 : vector<2x128xf32>
    %11 = math.exp %10 : vector<2x128xf32>
    %cst_6 = arith.constant dense<0.000000e+00> : vector<2xf32>
    %12 = vector.multi_reduction <add>, %11, %cst_6 [1] : vector<2x128xf32> to vector<2xf32>
    %13 = vector.shape_cast %12 : vector<2xf32> to vector<2x1xf32>
    %14 = vector.broadcast %13 : vector<2x1xf32> to vector<2x128xf32>
    %15 = arith.divf %11, %14 : vector<2x128xf32>
    %16 = vector.extract_strided_slice %15 {offsets = [0, 0], sizes = [2, 8], strides = [1, 1]} : vector<2x128xf32> to vector<2x8xf32>
    %c0_7 = arith.constant 0 : index
    %c0_8 = arith.constant 0 : index
    %17 = vector.load %arg4[%c0_7, %c0_8] : memref<2x8xf32, #tpu.memory_space<vmem>>, vector<2x8xf32>
    tpu.vector_store %arg4[%c0_7, %c0_8], %16 {strides = array<i32>} : memref<2x8xf32, #tpu.memory_space<vmem>>, vector<2x8xf32>,
    return
  }
  func.func @transform_0(%arg0: i32) -> (i32, i32) {
    %c0_i32 = arith.constant 0 : i32
    %c0_i32_0 = arith.constant 0 : i32
    return %arg0, %c0_i32 : i32, i32
  }
  func.func @transform_1(%arg0: i32) -> (i32, i32) {
    %c0_i32 = arith.constant 0 : i32
    %c0_i32_0 = arith.constant 0 : i32
    %c0_i32_1 = arith.constant 0 : i32
    return %c0_i32, %c0_i32_0 : i32, i32
  }
  func.func @transform_2(%arg0: i32) -> (i32, i32) {
    %c0_i32 = arith.constant 0 : i32
    %c0_i32_0 = arith.constant 0 : i32
    %c0_i32_1 = arith.constant 0 : i32
    return %c0_i32, %c0_i32_0 : i32, i32
  }
  func.func @transform_3(%arg0: i32) -> (i32, i32) {
    %c0_i32 = arith.constant 0 : i32
    %c0_i32_0 = arith.constant 0 : i32
    return %arg0, %c0_i32 : i32, i32
  }
}

</mosaic_0001>

<bundles_post_ra>
// kernel: ensemble_forward.1
= control target key start
LH: loop header
LB: loop body
LE: loop exit
PB: predicated region body
PF: predicated region fallthrough
CT: control target
= control target key end

     0   :  { %v24_v28 = vlaneseq  ;;  %v1024_v36 = vmov 1983009808   ;;  %s1256_s0 = inlined_call_operand.vmem [shape: f32[2,1024], index: 0, kind: input, shape index: {}]   ;;  %s1257_s1 = inlined_call_operand.vmem [shape: bf16[1024,128], index: 1, kind: input, shape index: {}]   ;;  %s1258_s2 = inlined_call_operand.vmem [shape: f32[1,128], index: 2, kind: input, shape index: {}]   ;;  %s1259_s3 = inlined_call_operand.hbm [shape: f32[2,8], index: 3, kind: output, shape index: {}]  }
   0x1   :  { %v932_v0 = vld [vmem:[%s1257_s1 + $0x78] sm:$0xff]   ;;  %v936_v4 = vld [vmem:[%s1257_s1 + $0x70] sm:$0xff]   ;;  %v940_v8 = vld [vmem:[%s1257_s1 + $0x68] sm:$0xff]   ;;  %v22_v37 = vunpack.c.l.s4 %v1024_v36 }
   0x2   :  { %v933_v1 = vld [vmem:[%s1257_s1 + $0xf8] sm:$0xff]   ;;  %842 = vmatprep.subr.bf16.mxu0 %v932_v0  ;;  %v937_v5 = vld [vmem:[%s1257_s1 + $0xf0] sm:$0xff]   ;;  %v941_v9 = vld [vmem:[%s1257_s1 + $0xe8] sm:$0xff]   ;;  %v25_v33 = vshrl.u32 %v24_v28, 7 }
   0x3   :  { %v934_v2 = vld [vmem:[%s1257_s1 + $0x38] sm:$0xff]   ;;  %864 = vmatprep.subr.bf16.mxu1 %v933_v1  ;;  %v938_v6 = vld [vmem:[%s1257_s1 + $0x30] sm:$0xff]   ;;  %v942_v10 = vld [vmem:[%s1257_s1 + $0x28] sm:$0xff]   ;;  %v23_v39 = vunpack.c.0.s8 %v22_v37 }
   0x4   :  { %v935_v3 = vld [vmem:[%s1257_s1 + $0xb8] sm:$0xff]   ;;  %843 = vmatpush3.bf16.msra.mxu0 %v934_v2  ;;  %v939_v7 = vld [vmem:[%s1257_s1 + $0xb0] sm:$0xff]   ;;  %v943_v11 = vld [vmem:[%s1257_s1 + $0xa8] sm:$0xff]  }
   0x5   :  { %865 = vmatpush3.bf16.msra.mxu1 %v935_v3  ;;  %844 = vmatprep.subr.bf16.mxu0 %v936_v4  ;;  %v944_v12 = vld [vmem:[%s1257_s1 + $0x60] sm:$0xff]   ;;  %v948_v16 = vld [vmem:[%s1257_s1 + $0x58] sm:$0xff]   ;;  %v952_v20 = vld [vmem:[%s1257_s1 + $0x50] sm:$0xff]   ;;  %v1151_v41 = vsub.s32 %v23_v39, %v25_v33 }
   0x6   :  { %866 = vmatprep.subr.bf16.mxu1 %v937_v5  ;;  %v945_v13 = vld [vmem:[%s1257_s1 + $0xe0] sm:$0xff]   ;;  %v949_v17 = vld [vmem:[%s1257_s1 + $0xd8] sm:$0xff]   ;;  %v953_v21 = vld [vmem:[%s1257_s1 + $0xd0] sm:$0xff]  }
   0x7   :  { %v946_v14 = vld [vmem:[%s1257_s1 + $0x20] sm:$0xff]   ;;  %v950_v18 = vld [vmem:[%s1257_s1 + $0x18] sm:$0xff]   ;;  %v954_v22 = vld [vmem:[%s1257_s1 + $0x10] sm:$0xff]  }
   0x8   :  { %845 = vmatpush3.bf16.msra.mxu0 %v938_v6  ;;  %v947_v15 = vld [vmem:[%s1257_s1 + $0xa0] sm:$0xff]   ;;  %v951_v19 = vld [vmem:[%s1257_s1 + $0x98] sm:$0xff]   ;;  %v955_v23 = vld [vmem:[%s1257_s1 + $0x90] sm:$0xff]  }
   0x9   :  { %867 = vmatpush3.bf16.msra.mxu1 %v939_v7  ;;  %846 = vmatprep.subr.bf16.mxu0 %v940_v8  ;;  %v956_v24 = vld [vmem:[%s1257_s1 + $0x48] sm:$0xff]   ;;  %v960_v29 = vld [vmem:[%s1257_s1 + $0x40] sm:$0xff]   ;;  %v965_v35 = vld [vmem:[%s1257_s1 + $0x178] sm:$0xff]  }
   0xa   :  { %868 = vmatprep.subr.bf16.mxu1 %v941_v9  ;;  %v957_v25 = vld [vmem:[%s1257_s1 + $0xc8] sm:$0xff]   ;;  %v961_v30 = vld [vmem:[%s1257_s1 + $0xc0] sm:$0xff]   ;;  %v966_v38 = vld [vmem:[%s1257_s1 + $0x1f8] sm:$0xff]  }
   0xb   :  { %v958_v26 = vld [vmem:[%s1257_s1 + $0x8] sm:$0xff]   ;;  %v962_v31 = vld [vmem:[%s1257_s1] sm:$0xff]   ;;  %v967_v46 = vld [vmem:[%s1257_s1 + $0x138] sm:$0xff]  }
   0xc   :  { %847 = vmatpush3.bf16.msra.mxu0 %v942_v10  ;;  %v959_v27 = vld [vmem:[%s1257_s1 + $0x88] sm:$0xff]   ;;  %v963_v32 = vld [vmem:[%s1257_s1 + $0x80] sm:$0xff]   ;;  %v968_v49 = vld [vmem:[%s1257_s1 + $0x1b8] sm:$0xff]  }
   0xd   :  { %869 = vmatpush3.bf16.msra.mxu1 %v943_v11  ;;  %848 = vmatprep.subr.bf16.mxu0 %v944_v12  ;;  %v16_v34 = vld [vmem:[%s1256_s0] sm:$0xff]  ;;  %v969_v52 = vld [vmem:[%s1257_s1 + $0x170] sm:$0xff]   ;;  %v973_v56 = vld [vmem:[%s1257_s1 + $0x168] sm:$0xff]  }
   0xe   :  { %870 = vmatprep.subr.bf16.mxu1 %v945_v13  ;;  %v20_v40 = vcombine.high %v16_v34, %v16_v34  ;;  %v27_v42 = vrot.slane %v16_v34, %v1151_v41  ;;  %v970_v53 = vld [vmem:[%s1257_s1 + $0x1f0] sm:$0xff]   ;;  %v974_v57 = vld [vmem:[%s1257_s1 + $0x1e8] sm:$0xff]   ;;  %v977_v60 = vld [vmem:[%s1257_s1 + $0x160] sm:$0xff]  }
   0xf   :  { %v971_v54 = vld [vmem:[%s1257_s1 + $0x130] sm:$0xff]   ;;  %v975_v58 = vld [vmem:[%s1257_s1 + $0x128] sm:$0xff]   ;;  %v978_v61 = vld [vmem:[%s1257_s1 + $0x1e0] sm:$0xff]  }
  0x10   :  { %849 = vmatpush3.bf16.msra.mxu0 %v946_v14  ;;  %v34_v43 = vrot.slane %v20_v40, %v1151_v41  ;;  %v35_v44 = vcombine.high %v27_v42, %v27_v42  ;;  %v62_v47 = vpack.c.bf16 %v27_v42, %v27_v42  ;;  %v972_v55 = vld [vmem:[%s1257_s1 + $0x1b0] sm:$0xff]   ;;  %v976_v59 = vld [vmem:[%s1257_s1 + $0x1a8] sm:$0xff]   ;;  %v979_v62 = vld [vmem:[%s1257_s1 + $0x120] sm:$0xff]  }
  0x11   :  { %871 = vmatpush3.bf16.msra.mxu1 %v947_v15  ;;  %850 = vmatprep.subr.bf16.mxu0 %v948_v16  ;;  %v980_v63 = vld [vmem:[%s1257_s1 + $0x1a0] sm:$0xff]   ;;  %v981_v0 = vld [vmem:[%s1257_s1 + $0x158] sm:$0xff]   ;;  %v985_v4 = vld [vmem:[%s1257_s1 + $0x150] sm:$0xff]  }
  0x12   :  { %872 = vmatprep.subr.bf16.mxu1 %v949_v17  ;;  %v36_v45 = vcombine.high %v34_v43, %v34_v43  ;;  %v64_v48 = vpack.c.bf16 %v34_v43, %v34_v43  ;;  %v63_v50 = vpack.c.bf16 %v35_v44, %v35_v44  ;;  %v982_v1 = vld [vmem:[%s1257_s1 + $0x1d8] sm:$0xff]   ;;  %v986_v5 = vld [vmem:[%s1257_s1 + $0x1d0] sm:$0xff]   ;;  %v989_v8 = vld [vmem:[%s1257_s1 + $0x148] sm:$0xff]  }
  0x13   :  { %v983_v2 = vld [vmem:[%s1257_s1 + $0x118] sm:$0xff]   ;;  %v987_v6 = vld [vmem:[%s1257_s1 + $0x110] sm:$0xff]   ;;  %v990_v9 = vld [vmem:[%s1257_s1 + $0x1c8] sm:$0xff]  }
  0x14   :  { %851 = vmatpush3.bf16.msra.mxu0 %v950_v18  ;;  %v65_v51 = vpack.c.bf16 %v36_v45, %v36_v45  ;;  %621 = vmatprep.mubr.bf16.mxu0 %v63_v50  ;;  %v984_v3 = vld [vmem:[%s1257_s1 + $0x198] sm:$0xff]   ;;  %v988_v7 = vld [vmem:[%s1257_s1 + $0x190] sm:$0xff]   ;;  %v17_v10 = vld [vmem:[%s1256_s0 + $0x8] sm:$0xff] }
  0x15   :  { %873 = vmatpush3.bf16.msra.mxu1 %v951_v19  ;;  %852 = vmatprep.subr.bf16.mxu0 %v952_v20 }
  0x16   :  { %874 = vmatprep.subr.bf16.mxu1 %v953_v21  ;;  %661 = vmatprep.mubr.bf16.mxu1 %v65_v51 }
  0x18   :  { %853 = vmatpush3.bf16.msra.mxu0 %v954_v22 }
  0x19   :  { %875 = vmatpush3.bf16.msra.mxu1 %v955_v23  ;;  %854 = vmatprep.subr.bf16.mxu0 %v956_v24 }
  0x1a   :  { %876 = vmatprep.subr.bf16.mxu1 %v957_v25 }
  0x1c   :  { %855 = vmatpush3.bf16.msra.mxu0 %v958_v26 }
  0x1d   :  { %877 = vmatpush3.bf16.msra.mxu1 %v959_v27  ;;  %856 = vmatprep.subr.bf16.mxu0 %v960_v29 }
  0x1e   :  { %878 = vmatprep.subr.bf16.mxu1 %v961_v30 }
  0x20   :  { %857 = vmatpush3.bf16.msra.mxu0 %v962_v31 }
  0x21   :  { %879 = vmatpush3.bf16.msra.mxu1 %v963_v32  ;;  %886 = vmatprep.subr.bf16.mxu0 %v965_v35 }
  0x22   :  { %908 = vmatprep.subr.bf16.mxu1 %v966_v38 }
  0x23   :  { %622 = vmatmul.mubr.bf16.vlgmr.msra.gmra.mxu0 %v62_v47 }
  0x24   :  { %662 = vmatmul.mubr.bf16.vlgmr.msra.gmra.mxu1 %v64_v48  ;;  %887 = vmatpush3.bf16.msra.mxu0 %v967_v46 }
  0x25   :  { %909 = vmatpush3.bf16.msra.mxu1 %v968_v49  ;;  %888 = vmatprep.subr.bf16.mxu0 %v969_v52 }
  0x26   :  { %910 = vmatprep.subr.bf16.mxu1 %v970_v53 }
  0x28   :  { %889 = vmatpush3.bf16.msra.mxu0 %v971_v54 }
  0x29   :  { %911 = vmatpush3.bf16.msra.mxu1 %v972_v55  ;;  %890 = vmatprep.subr.bf16.mxu0 %v973_v56 }
  0x2a   :  { %912 = vmatprep.subr.bf16.mxu1 %v974_v57 }
  0x2c   :  { %891 = vmatpush3.bf16.msra.mxu0 %v975_v58 }
  0x2d   :  { %913 = vmatpush3.bf16.msra.mxu1 %v976_v59  ;;  %892 = vmatprep.subr.bf16.mxu0 %v977_v60 }
  0x2e   :  { %914 = vmatprep.subr.bf16.mxu1 %v978_v61 }
  0x30   :  { %893 = vmatpush3.bf16.msra.mxu0 %v979_v62 }
  0x31   :  { %915 = vmatpush3.bf16.msra.mxu1 %v980_v63  ;;  %894 = vmatprep.subr.bf16.mxu0 %v981_v0 }
  0x32   :  { %916 = vmatprep.subr.bf16.mxu1 %v982_v1 }
  0x34   :  { %895 = vmatpush3.bf16.msra.mxu0 %v983_v2 }
  0x35   :  { %917 = vmatpush3.bf16.msra.mxu1 %v984_v3  ;;  %896 = vmatprep.subr.bf16.mxu0 %v985_v4 }
  0x36   :  { %918 = vmatprep.subr.bf16.mxu1 %v986_v5 }
  0x37   :  { %8 = vsyncpa [#allocation3], 0  ;;  %v44_v11 = vrot.slane %v17_v10, %v1151_v41  ;;  %v37_v12 = vcombine.high %v17_v10, %v17_v10  ;;  %v991_v13 = vld [vmem:[%s1257_s1 + $0x108] sm:$0xff]   ;;  %v993_v17 = vld [vmem:[%s1257_s1 + $0x140] sm:$0xff]   ;;  %vm749_vm0 = vcmask 1041408   ;;  %vm761_vm1 = vcmask 58368  }
  0x38   :  { %897 = vmatpush3.bf16.msra.mxu0 %v987_v6  ;;  %v992_v14 = vld [vmem:[%s1257_s1 + $0x188] sm:$0xff]   ;;  %v994_v18 = vld [vmem:[%s1257_s1 + $0x1c0] sm:$0xff]  }
  0x39   :  { %919 = vmatpush3.bf16.msra.mxu1 %v988_v7  ;;  %v52_v15 = vcombine.high %v44_v11, %v44_v11  ;;  %v51_v16 = vrot.slane %v37_v12, %v1151_v41  ;;  %898 = vmatprep.subr.bf16.mxu0 %v989_v8  ;;  %v995_v21 = vld [vmem:[%s1257_s1 + $0x100] sm:$0xff]   ;;  %v66_v24 = vpack.c.bf16 %v44_v11, %v44_v11 }
  0x3a   :  { %920 = vmatprep.subr.bf16.mxu1 %v990_v9  ;;  %v996_v22 = vld [vmem:[%s1257_s1 + $0x180] sm:$0xff]  }
  0x3b   :  { %v67_v19 = vpack.c.bf16 %v52_v15, %v52_v15  ;;  %v53_v20 = vcombine.high %v51_v16, %v51_v16  ;;  %v68_v25 = vpack.c.bf16 %v51_v16, %v51_v16  ;;  %v777_v35 = vld [vmem:[%s1258_s2] ss:$0 sm:$0xff]  ;;  %s1025_s2 = smov [#allocation2]  }
  0x3c   :  { %899 = vmatpush3.bf16.msra.mxu0 %v991_v13  ;;  %s769_s9 = sshll.u32 %s1025_s2, 4  ;;  %s770_s9 = int_to_ptr.vmem [resolvable:$true] %s769_s9 }
  0x3d   :  { %921 = vmatpush3.bf16.msra.mxu1 %v992_v14  ;;  %v69_v23 = vpack.c.bf16 %v53_v20, %v53_v20  ;;  %900 = vmatprep.subr.bf16.mxu0 %v993_v17  ;;  %s1002_s10 = scalar_lea.vmem %s770_s9, 32  ;;  %p1007_p1 = scmp.lt.s32.totalorder %s770_s9, %s770_s9 }
  0x3e   :  { %922 = vmatprep.subr.bf16.mxu1 %v994_v18  ;;  %701 = vmatprep.mubr.bf16.mxu0 %v67_v19  ;;  %p1003_p0 = scmp.ne.s32.totalorder %s770_s9, %s1002_s10  ;;  %p1008_p2 = scmp.lt.s32.totalorder %s1002_s10, %s1002_s10 }
  0x3f   :  { %741 = vmatprep.mubr.bf16.mxu1 %v69_v23 }
  0x40   :  { %901 = vmatpush3.bf16.msra.mxu0 %v995_v21  ;;  %p1009_p3 = por %p1008_p2, %p1007_p1 }
  0x41   :  { %923 = vmatpush3.bf16.msra.mxu1 %v996_v22 }
  0x42   :  { %p1010_p4 = pnand %p1009_p3, %p1003_p0 }
  0x43   :  { %702 = vmatmul.mubr.bf16.vlgmr.msra.gmra.mxu0 %v66_v24 }
  0x44   :  { %742 = vmatmul.mubr.bf16.vlgmr.msra.gmra.mxu1 %v68_v25 }
  0xe3   :  { %v858_v26 = vpop.f32.mrf.mxu0 }
  0xe4   :  { %v880_v27 = vpop.f32.mrf.mxu1 }
  0xe5   :  { %v859_v28 = vpop.f32.mrf.mxu0 }
  0xe6   :  { %v881_v29 = vpop.f32.mrf.mxu1  ;;  %v860_v34 = vadd.f32 %v859_v28, %v858_v26 }
  0xe7   :  { %v861_v30 = vpop.f32.mrf.mxu0  ;;  %v882_v37 = vadd.f32 %v881_v29, %v880_v27 }
  0xe8   :  { %v883_v31 = vpop.f32.mrf.mxu1  ;;  %v624_v36 = vadd.f32 %v860_v34, %v777_v35 }
  0xe9   :  { %v862_v32 = vpop.f32.mrf.mxu0 }
  0xea   :  { %v884_v33 = vpop.f32.mrf.mxu1  ;;  %v664_v42 = vadd.f32 %v882_v37, %v624_v36 }
 0x103   :  { %v902_v38 = vpop.f32.mrf.mxu0 }
 0x104   :  { %v924_v39 = vpop.f32.mrf.mxu1 }
 0x105   :  { %v903_v40 = vpop.f32.mrf.mxu0 }
 0x106   :  { %v925_v41 = vpop.f32.mrf.mxu1  ;;  %v904_v43 = vadd.f32 %v903_v40, %v902_v38 }
 0x107   :  { %v905_v44 = vpop.f32.mrf.mxu0  ;;  %v926_v47 = vadd.f32 %v925_v41, %v924_v39 }
 0x108   :  { %v927_v45 = vpop.f32.mrf.mxu1  ;;  %v704_v46 = vadd.f32 %v904_v43, %v664_v42 }
 0x109   :  { %v906_v48 = vpop.f32.mrf.mxu0 }
 0x10a   :  { %v928_v49 = vpop.f32.mrf.mxu1  ;;  %v744_v50 = vadd.f32 %v926_v47, %v704_v46 }
 0x10c   :  { %v750_v51 = vsel %vm749_vm0, %v744_v50, -inf }
 0x10d   :  { %751 = vmax.xlane.f32.xlu0 %v750_v51 }
 0x196   :  { %v752_v52 = vpop.xlane.xlu0 %751 }
 0x197   :  { %v753_v53 = vsub.f32 %v744_v50, %v752_v52 }
 0x199   :  { %v754_v54 = vmul.f32 1.442695, %v753_v53 }
 0x19b   :  { %998 = vpow2.f32 %v754_v54 }
 0x1a8   :  { %v999_v55 = vpop.eup %998 }
 0x1a9   :  { %v756_v56 = vsel %vm749_vm0, %v999_v55, 0.0 }
 0x1aa   :  { %757 = vadd.xlane.f32.xlu0 %v756_v56 }
 0x233   :  { %v758_v57 = vpop.xlane.xlu0 %757 }
 0x234   :  { %1000 = vrcp.f32 %v758_v57 }
 0x241   :  { %v1001_v58 = vpop.eup %1000 }
 0x242   :  { %v760_v59 = vmul.f32 %v1001_v58, %v999_v55 }
 0x244   :  { %762 = vst.msk [vmem:[#allocation2] sm:$0x3] %vm761_vm1, %v760_v59 }
 0x245   :  { %1013 = shalt.err (!%p1010_p4)
}
 0x246   :  { %772 = dma.vmem_to_hbm [thread:$0]  %s770_s9, 32, %s1259_s3, [#allocation3]  }
 0x247   :  { %1022 = dma.done.wait [#allocation3], 32  }
 0x248   :  { %1023 = vsyncadd [#allocation3], 4294967264 }
 0x249   :  { %776 = vsyncpa [#allocation3], 1 }

</bundles_post_ra>
